<compile_context>
chip_gen: v5e
topology: v5e:2x2
jax: 0.10.0
libtpu: 0.0.40
codegen_flags: <defaults>
</compile_context>

<pallas_src>
import functools
import math

import jax
import jax.numpy as jnp
from jax.experimental import pallas as pl
from jax.experimental.pallas import tpu as pltpu


def _round_up(v, m):
    return (v + m - 1) // m * m


def _pick_tile(dim16, cap):
    """Largest multiple-of-16 tile <= cap, preferring one that divides dim16
    exactly (avoids materializing a padded copy of the big operand)."""
    cap = min(cap, dim16)
    for t in range(cap, 15, -16):
        if dim16 % t == 0 and t * 4 >= cap:
            return t
    return cap


def _pad2d(a, rows, cols, dtype):
    """Cast + zero-pad to (rows, cols); skips the pad copy when not needed."""
    r0, c0 = a.shape
    a = a.astype(dtype)
    if r0 == rows and c0 == cols:
        return a
    return jnp.zeros((rows, cols), dtype).at[:r0, :c0].set(a)


# ---------------------------------------------------------------------------
# Kernels.  Grid = (row tiles of adj, K tiles over adj columns).  K is last
# ("arbitrary", reduction); rows are "parallel" (megacore sharding on v7x).
# ---------------------------------------------------------------------------

def _gcn_pre_kernel(adj_ref, f_ref, b_ref, o_ref, acc_ref, *, f_resident):
    """out = relu(adj @ F + b), with F = x @ W.T precomputed in the wrapper."""
    k = pl.program_id(1)

    @pl.when(k == 0)
    def _():
        # Fold the bias into the accumulator init (once per row tile).
        acc_ref[...] = jnp.broadcast_to(
            b_ref[...].astype(jnp.float32), acc_ref.shape)

    # Resident F is stored as (n_k, tk, p); pick the current K slab by index.
    f_blk = f_ref[k] if f_resident else f_ref[...]

    acc_ref[...] += jnp.dot(adj_ref[...], f_blk,
                            preferred_element_type=jnp.float32)

    @pl.when(k == pl.num_programs(1) - 1)
    def _():
        o_ref[...] = jnp.maximum(acc_ref[...], 0.0).astype(o_ref.dtype)


def _gcn_post_kernel(adj_ref, x_ref, w_ref, b_ref, o_ref, acc_ref, *,
                     x_resident):
    """out = relu((adj @ x) @ W + b); linear applied once per row tile."""
    k = pl.program_id(1)

    @pl.when(k == 0)
    def _():
        acc_ref[...] = jnp.zeros_like(acc_ref)

    x_blk = x_ref[k] if x_resident else x_ref[...]

    acc_ref[...] += jnp.dot(adj_ref[...], x_blk,
                            preferred_element_type=jnp.float32)

    @pl.when(k == pl.num_programs(1) - 1)
    def _():
        h = jnp.dot(acc_ref[...].astype(w_ref.dtype), w_ref[...],
                    preferred_element_type=jnp.float32)
        h = h + b_ref[...].astype(jnp.float32)
        o_ref[...] = jnp.maximum(h, 0.0).astype(o_ref.dtype)


# ---------------------------------------------------------------------------
# Wrapper.
# ---------------------------------------------------------------------------

def gcn_layer(x, adj, weight, bias, *, compute_dtype=jnp.bfloat16,
              resident_bytes=4 * 1024 * 1024):
    """x: [N, in_dim], adj: [N, N], weight: [out_dim, in_dim] (PyTorch layout),
    bias: [out_dim].  Returns relu(adj @ x @ weight.T + bias): [N, out_dim]."""
    n, in_dim = x.shape
    out_dim = weight.shape[0]
    out_dtype = x.dtype
    cd = jnp.dtype(compute_dtype)
    cd_bytes = cd.itemsize

    p_in = _round_up(in_dim, 128)
    p_out = _round_up(out_dim, 128)
    # Run the dominant N^2 contraction against the narrower padded feature dim.
    pre_project = p_out <= p_in
    p_feat = p_out if pre_project else p_in

    # ---- tiling (16-aligned for bf16 sublane packing) ----------------------
    n16 = _round_up(max(n, 1), 16)
    tm = _pick_tile(n16, 512)
    if _round_up(n, tm) // tm < 2 and tm % 32 == 0:
        tm //= 2                      # keep both v7x TensorCores busy
    tk = _pick_tile(n16, 2048)
    n_r = _round_up(n, tm)
    n_c = _round_up(n, tk)
    grid = (n_r // tm, n_c // tk)

    # ---- operands (padding copies skipped when tiles divide N exactly) -----
    adj_p = _pad2d(adj, n_r, n_c, cd)
    b_p = jnp.zeros((1, p_out), jnp.float32).at[0, :out_dim].set(
        bias.astype(jnp.float32))

    f_resident = n_c * p_feat * cd_bytes <= resident_bytes
    adj_steps = grid[0] * grid[1]
    if adj_steps >= 3:
        adj_spec = pl.BlockSpec((tm, tk), lambda i, k: (i, k),
                                pipeline_mode=pl.Buffered(3))
    else:
        adj_spec = pl.BlockSpec((tm, tk), lambda i, k: (i, k))
    bias_spec = pl.BlockSpec((1, p_out), lambda i, k: (0, 0))
    out_spec = pl.BlockSpec((tm, p_out), lambda i, k: (i, 0))

    def feat_operand(mat):
        """Pad the (N, feat) operand; make it fully resident if it is small."""
        fp = _pad2d(mat, n_c, p_feat, cd)
        if f_resident:
            n_k = n_c // tk
            fp = fp.reshape(n_k, tk, p_feat)
            spec = pl.BlockSpec((n_k, tk, p_feat), lambda i, k: (0, 0, 0))
        else:
            spec = pl.BlockSpec((tk, p_feat), lambda i, k: (k, 0))
        return fp, spec

    out_bytes = jnp.dtype(out_dtype).itemsize
    flops = 2 * n_r * n_c * p_feat
    bytes_accessed = (n_r * n_c * cd_bytes
                      + (1 if f_resident else grid[0]) * n_c * p_feat * cd_bytes
                      + n_r * p_out * out_bytes)

    if pre_project:
        # One XLA matmul, cast to bf16 exactly once.
        f, feat_spec = feat_operand(jnp.matmul(x, weight.T))
        kernel = functools.partial(_gcn_pre_kernel, f_resident=f_resident)
        in_specs = [adj_spec, feat_spec, bias_spec]
        operands = (adj_p, f, b_p)
        acc_cols = p_out
    else:
        f, feat_spec = feat_operand(x)
        w_p = _pad2d(weight.T, p_in, p_out, cd)
        kernel = functools.partial(_gcn_post_kernel, x_resident=f_resident)
        w_spec = pl.BlockSpec((p_in, p_out), lambda i, k: (0, 0))
        in_specs = [adj_spec, feat_spec, w_spec, bias_spec]
        operands = (adj_p, f, w_p, b_p)
        acc_cols = p_in
        flops += 2 * n_r * p_in * p_out
        bytes_accessed += p_in * p_out * cd_bytes

    out_padded = pl.pallas_call(
        kernel,
        out_shape=jax.ShapeDtypeStruct((n_r, p_out), out_dtype),
        grid_spec=pltpu.PrefetchScalarGridSpec(
            num_scalar_prefetch=0,
            grid=grid,
            in_specs=in_specs,
            out_specs=out_spec,
            scratch_shapes=[pltpu.VMEM((tm, acc_cols), jnp.float32)],
        ),
        compiler_params=pltpu.CompilerParams(
            dimension_semantics=("parallel", "arbitrary"),
            vmem_limit_bytes=48 * 1024 * 1024,   # safe on v7x (64 MiB/TC)
        ),
        cost_estimate=pl.CostEstimate(
            flops=flops, transcendentals=0, bytes_accessed=bytes_accessed),
    )(*operands)

    # Strip row / lane padding.
    return out_padded[:n, :out_dim]


if __name__ == "__main__":
    key = jax.random.PRNGKey(0)

    def make_case(k, n, in_dim, out_dim):
        kx, kadj, kw, kb = jax.random.split(k, 4)
        x = jax.random.normal(kx, (n, in_dim), dtype=jnp.float32)
        adj_raw = jax.random.uniform(kadj, (n, n), dtype=jnp.float32)
        adj = adj_raw / jnp.sum(adj_raw, axis=-1, keepdims=True)
        bound = 1.0 / math.sqrt(in_dim)
        weight = jax.random.uniform(kw, (out_dim, in_dim), minval=-bound,
                                    maxval=bound, dtype=jnp.float32)
        bias = jax.random.uniform(kb, (out_dim,), minval=-bound, maxval=bound,
                                  dtype=jnp.float32)
        return x, adj, weight, bias

    k1, k2 = jax.random.split(key)

    # Case 1: padded out_dim <= padded in_dim -> kernel computes adj @ (x @ W.T).
    x, adj, w, b = make_case(k1, 8, 32, 16)
    out = gcn_layer(x, adj, w, b)
    jax.block_until_ready(out)
    ref = jnp.maximum(jnp.matmul(adj, x) @ w.T + b, 0.0)
    assert out.shape == ref.shape and out.dtype == x.dtype
    assert jnp.allclose(out, ref, atol=2e-2, rtol=2e-2)

    # Case 2: padded out_dim > padded in_dim -> kernel computes (adj @ x) @ W.T.
    x, adj, w, b = make_case(k2, 24, 16, 200)
    out = gcn_layer(x, adj, w, b)
    jax.block_until_ready(out)
    ref = jnp.maximum(jnp.matmul(adj, x) @ w.T + b, 0.0)
    assert out.shape == ref.shape and out.dtype == x.dtype
    assert jnp.allclose(out, ref, atol=2e-2, rtol=2e-2)

    print("KERNEL_OK")
</pallas_src>

<mosaic_0001>
module attributes {stable_mosaic.version = 11 : i64} {
  func.func @_gcn_pre_kernel(%arg0: i32, %arg1: i32, %arg2: memref<16x16xbf16, #tpu.memory_space<vmem>>, %arg3: memref<1x16x128xbf16, #tpu.memory_space<vmem>>, %arg4: memref<1x128xf32, #tpu.memory_space<vmem>>, %arg5: memref<16x128xf32, #tpu.memory_space<vmem>>, %arg6: memref<16x128xf32, #tpu.memory_space<vmem>>) attributes {dimension_semantics = [#tpu.dimension_semantics<parallel>, #tpu.dimension_semantics<arbitrary>], iteration_bounds = array<i64: 1, 1>, scalar_prefetch = 0 : i64, scratch_operands = 1 : i64, tpu.core_type = #tpu.core_type<tc>, window_params = [{transform_indices = @transform_0, window_bounds = array<i64: 16, 16>}, {pipeline_mode = #tpu.pipeline_mode<synchronous>, transform_indices = @transform_1, window_bounds = array<i64: 1, 16, 128>}, {pipeline_mode = #tpu.pipeline_mode<synchronous>, transform_indices = @transform_2, window_bounds = array<i64: 1, 128>}, {transform_indices = @transform_3, window_bounds = array<i64: 16, 128>}]} {
    %c0_i32 = arith.constant 0 : i32
    %0 = arith.cmpi eq, %arg1, %c0_i32 : i32
    %1 = arith.extui %0 : i1 to i32
    %c0_i32_0 = arith.constant 0 : i32
    %2 = arith.cmpi ne, %1, %c0_i32_0 : i32
    scf.if %2 {
      %c0_10 = arith.constant 0 : index
      %c0_11 = arith.constant 0 : index
      %14 = vector.load %arg4[%c0_10, %c0_11] : memref<1x128xf32, #tpu.memory_space<vmem>>, vector<1x128xf32>
      %15 = vector.shape_cast %14 : vector<1x128xf32> to vector<1x128xf32>
      %16 = vector.broadcast %15 : vector<1x128xf32> to vector<16x128xf32>
      %c0_12 = arith.constant 0 : index
      %c0_13 = arith.constant 0 : index
      %17 = vector.load %arg6[%c0_12, %c0_13] : memref<16x128xf32, #tpu.memory_space<vmem>>, vector<16x128xf32>
      tpu.vector_store %arg6[%c0_12, %c0_13], %16 {strides = array<i32>} : memref<16x128xf32, #tpu.memory_space<vmem>>, vector<16x128xf32>,
    } else {
    }
    %3 = arith.index_cast %arg1 : i32 to index
    %c0 = arith.constant 0 : index
    %c0_1 = arith.constant 0 : index
    %4 = vector.load %arg3[%3, %c0, %c0_1] : memref<1x16x128xbf16, #tpu.memory_space<vmem>>, vector<1x16x128xbf16>
    %5 = vector.shape_cast %4 : vector<1x16x128xbf16> to vector<16x128xbf16>
    %c0_2 = arith.constant 0 : index
    %c0_3 = arith.constant 0 : index
    %6 = vector.load %arg6[%c0_2, %c0_3] : memref<16x128xf32, #tpu.memory_space<vmem>>, vector<16x128xf32>
    %c0_4 = arith.constant 0 : index
    %c0_5 = arith.constant 0 : index
    %7 = vector.load %arg2[%c0_4, %c0_5] : memref<16x16xbf16, #tpu.memory_space<vmem>>, vector<16x16xbf16>
    %cst = arith.constant dense<0.000000e+00> : vector<16x128xf32>
    %8 = tpu.matmul %7, %5, %cst {dimension_numbers = #tpu.dot_dimension_numbers<[1], [0], [0], [1], [0, 0, 1, 1], [], []>} : vector<16x16xbf16>, vector<16x128xbf16>, vector<16x128xf32> -> vector<16x128xf32>
    %9 = arith.addf %6, %8 : vector<16x128xf32>
    %c0_6 = arith.constant 0 : index
    %c0_7 = arith.constant 0 : index
    %10 = vector.load %arg6[%c0_6, %c0_7] : memref<16x128xf32, #tpu.memory_space<vmem>>, vector<16x128xf32>
    tpu.vector_store %arg6[%c0_6, %c0_7], %9 {strides = array<i32>} : memref<16x128xf32, #tpu.memory_space<vmem>>, vector<16x128xf32>,
    %c0_i32_8 = arith.constant 0 : i32
    %11 = arith.cmpi eq, %arg1, %c0_i32_8 : i32
    %12 = arith.extui %11 : i1 to i32
    %c0_i32_9 = arith.constant 0 : i32
    %13 = arith.cmpi ne, %12, %c0_i32_9 : i32
    scf.if %13 {
      %c0_10 = arith.constant 0 : index
      %c0_11 = arith.constant 0 : index
      %14 = vector.load %arg6[%c0_10, %c0_11] : memref<16x128xf32, #tpu.memory_space<vmem>>, vector<16x128xf32>
      %cst_12 = arith.constant 0.000000e+00 : f32
      %15 = vector.broadcast %cst_12 : f32 to vector<16x128xf32>
      %16 = arith.maximumf %14, %15 : vector<16x128xf32>
      %c0_13 = arith.constant 0 : index
      %c0_14 = arith.constant 0 : index
      %17 = vector.load %arg5[%c0_13, %c0_14] : memref<16x128xf32, #tpu.memory_space<vmem>>, vector<16x128xf32>
      tpu.vector_store %arg5[%c0_13, %c0_14], %16 {strides = array<i32>} : memref<16x128xf32, #tpu.memory_space<vmem>>, vector<16x128xf32>,
    } else {
    }
    return
  }
  func.func @transform_0(%arg0: i32, %arg1: i32) -> (i32, i32) {
    %c0_i32 = arith.constant 0 : i32
    return %arg0, %arg1 : i32, i32
  }
  func.func @transform_1(%arg0: i32, %arg1: i32) -> (i32, i32, i32) {
    %c0_i32 = arith.constant 0 : i32
    %c0_i32_0 = arith.constant 0 : i32
    %c0_i32_1 = arith.constant 0 : i32
    %c0_i32_2 = arith.constant 0 : i32
    return %c0_i32, %c0_i32_0, %c0_i32_1 : i32, i32, i32
  }
  func.func @transform_2(%arg0: i32, %arg1: i32) -> (i32, i32) {
    %c0_i32 = arith.constant 0 : i32
    %c0_i32_0 = arith.constant 0 : i32
    %c0_i32_1 = arith.constant 0 : i32
    return %c0_i32, %c0_i32_0 : i32, i32
  }
  func.func @transform_3(%arg0: i32, %arg1: i32) -> (i32, i32) {
    %c0_i32 = arith.constant 0 : i32
    %c0_i32_0 = arith.constant 0 : i32
    return %arg0, %c0_i32 : i32, i32
  }
}

</mosaic_0001>

<bundles_post_ra>
// kernel: tpu_custom_call.1
= control target key start
LH: loop header
LB: loop body
LE: loop exit
PB: predicated region body
PF: predicated region fallthrough
CT: control target
= control target key end

     0   :  { %8 = vsyncpa [#allocation4], 0  ;;  %s265_s0 = inlined_call_operand.hbm [shape: bf16[16,16], index: 0, kind: input, shape index: {}]   ;;  %s266_s1 = inlined_call_operand.hbm [shape: bf16[1,16,128], index: 1, kind: input, shape index: {}]   ;;  %s267_s2 = inlined_call_operand.vmem [shape: f32[1,128], index: 2, kind: input, shape index: {}]   ;;  %s268_s3 = inlined_call_operand.hbm [shape: f32[16,128], index: 3, kind: output, shape index: {}]  }
   0x1   :  { %9 = vsyncpa [#allocation7], 0 }
   0x2   :  { %10 = vsyncpa [#allocation5], 0  ;;  %s15_s14 = sshll.u32 %s265_s0, 4  ;;  %s226_s15 = smov [#allocation3]   ;;  %s16_s14 = int_to_ptr.hbm [resolvable:$true] %s15_s14 }
   0x3   :  { %s17_s16 = sshll.u32 %s226_s15, 4  ;;  %s28_s19 = sshll.u32 %s266_s1, 4  ;;  %s18_s16 = int_to_ptr.vmem [resolvable:$true] %s17_s16  ;;  %s29_s19 = int_to_ptr.hbm [resolvable:$true] %s28_s19 }
   0x4   :  { %s227_s20 = smov 64   ;;  %s228_s21 = smov 4  }
   0x5   :  { %23 = dma.hbm_to_vmem [thread:$0]  %s16_s14, 128, %s18_s16, [#allocation4], %s227_s20, %s227_s20, %s228_s21  }
   0x6   :  { %s229_s22 = smov [#allocation6]  }
   0x7   :  { %s30_s23 = sshll.u32 %s229_s22, 4  ;;  %s31_s23 = int_to_ptr.vmem [resolvable:$true] %s30_s23 }
   0x8   :  { %36 = dma.hbm_to_vmem [thread:$0]  %s29_s19, 128, %s31_s23, [#allocation7], %s227_s20, %s227_s20, %s228_s21  }
   0x9   :  { %220 = dma.done.wait [#allocation4], 128  }
   0xa   :  { %221 = vsyncadd [#allocation4], 4294967168 }
   0xb   :  { %222 = dma.done.wait [#allocation7], 128  }
   0xc   :  { %223 = vsyncadd [#allocation7], 4294967168  ;;  %v138_v0 = vld [vmem:[#allocation6] sm:$0xff]  ;;  %v139_v1 = vld [vmem:[#allocation3] sm:$0xff]  ;;  %vm78_vm0 = vcmask 130048   ;;  %s230_s1 = smov [#allocation8]  }
   0xd   :  { %89 = vmatpush.bf16.msra.mxu0 %v138_v0  ;;  %v147_v2 = vld [vmem:[%s267_s2] ss:$0 sm:$0xff]  ;;  %s113_s25 = sshll.u32 %s230_s1, 4  ;;  %s115_s28 = sshll.u32 %s268_s3, 4  ;;  %s114_s25 = int_to_ptr.vmem [resolvable:$true] %s113_s25  ;;  %s116_s28 = int_to_ptr.hbm [resolvable:$true] %s115_s28 }
   0xe   :  { %s231_s29 = smov 128   ;;  %s232_s30 = smov 8  }
  0x10   :  { %137 = vmatmul.msk.bf16.vlgmr.msra.gmra.mxu0 %vm78_vm0, %v139_v1 }
  0x8d   :  { %v91_v3 = vpop.f32.mrf.mxu0 }
  0x8e   :  { %v96_v4 = vadd.f32 %v147_v2, %v91_v3 }
  0x90   :  { %v105_v5 = vmax.f32 %v96_v4, 0.0 }
  0x92   :  { %107 = vst [vmem:[#allocation8] sm:$0xff] %v105_v5 }
  0x95   :  { %v93_v6 = vpop.f32.mrf.mxu0 }
  0x96   :  { %v97_v7 = vadd.f32 %v147_v2, %v93_v6 }
  0x98   :  { %v106_v8 = vmax.f32 %v97_v7, 0.0 }
  0x9a   :  { %108 = vst [vmem:[#allocation8 + $0x8] sm:$0xff] %v106_v8 }
  0x9b   :  { %121 = dma.vmem_to_hbm [thread:$0]  %s114_s25, 256, %s116_s28, [#allocation5], %s231_s29, %s231_s29, %s232_s30  }
  0x9c   :  { %224 = dma.done.wait [#allocation5], 256  }
  0x9d   :  { %225 = vsyncadd [#allocation5], 4294967040 }
  0x9e   :  { %126 = vsyncpa [#allocation4], 1 }
  0x9f   :  { %127 = vsyncpa [#allocation7], 1 }
  0xa0   :  { %128 = vsyncpa [#allocation5], 1 }

</bundles_post_ra>
